<compile_context>
chip_gen: v7x
topology: tpu7x:2x2x1
jax: 0.10.0
libtpu: 0.0.40
codegen_flags: <defaults>
</compile_context>

<pallas_src>
import functools

import jax
import jax.numpy as jnp
from jax import lax
from jax.experimental import pallas as pl
from jax.experimental.pallas import tpu as pltpu


def _rotate_kernel(z_ref, r_ref, o_ref, *, d):
    """out[:, :d] = einsum('ij,bj->bi', R, z[:, :d]) ; out[:, d:] = z[:, d:]."""
    z_lo = z_ref[:, :d]
    # einsum('ij,bj->bi', R, z_lo): contract z axis 1 with R axis 1 -> (TM, d).
    # Expressed via dot_general so Mosaic never materializes R.T (no XLU vxpose).
    lo = lax.dot_general(
        z_lo,
        r_ref[...],
        dimension_numbers=(((1,), (1,)), ((), ())),
        preferred_element_type=jnp.float32,
    )
    o_ref[:, :d] = lo.astype(o_ref.dtype)
    if d < z_ref.shape[1]:
        # Pass-through columns: direct lane-aligned store (d is expected to be a
        # multiple of 128 for unmasked vst; still numerically correct otherwise).
        o_ref[:, d:] = z_ref[:, d:]


def _pick_batch_tile(B, D, itemsize):
    """Largest batch tile whose double-buffered in+out blocks stay in a v7x-safe budget."""
    budget = 24 * 1024 * 1024  # ~24 MiB for 2x(in)+2x(out) tiles; safe on 64 MiB v7x VMEM
    tm = budget // max(1, 4 * D * itemsize)
    tm = int(max(8, min(1024, tm)))
    tm = (tm // 8) * 8  # f32 sublane multiple
    if B <= tm:
        return B  # single block over batch (block == full dim is always legal)
    return tm


def rotate_forward(z: jax.Array, R: jax.Array, latent_size: int) -> jax.Array:
    """Pallas implementation of RotateModule.forward (eval-mode: no grad hook)."""
    B, D = z.shape
    d = R.shape[1]

    # Mirror PyTorch branch selection / error behavior:
    # latent_size == D requires a full-size rotation matrix (einsum would fail otherwise).
    if latent_size == D and d != D:
        raise ValueError(
            f"latent_size ({latent_size}) == feature dim but rotation is {R.shape}; "
            "full rotation requires R.shape[1] == z.shape[-1]."
        )

    itemsize = jnp.dtype(z.dtype).itemsize
    TM = _pick_batch_tile(B, D, itemsize)

    # Pad batch so the grid tiles it exactly (padded rows are discarded afterwards).
    Bp = pl.cdiv(B, TM) * TM
    z_in = z if Bp == B else jnp.pad(z, ((0, Bp - B), (0, 0)))

    # VMEM budget: double-buffered in+out tiles + R (+ headroom).
    needed = 4 * TM * D * itemsize + 2 * d * d * R.dtype.itemsize
    vmem_limit = int(min(max(2 * needed, 32 * 1024 * 1024), 100 * 1024 * 1024))

    kernel = functools.partial(_rotate_kernel, d=d)
    out = pl.pallas_call(
        kernel,
        out_shape=jax.ShapeDtypeStruct((Bp, D), z.dtype),
        grid=(Bp // TM,),
        in_specs=[
            pl.BlockSpec((TM, D), lambda i: (i, 0)),   # batch-tiled z
            pl.BlockSpec((d, d), lambda i: (0, 0)),    # R resident across steps
        ],
        out_specs=pl.BlockSpec((TM, D), lambda i: (i, 0)),
        compiler_params=pltpu.CompilerParams(
            dimension_semantics=("parallel",),
            vmem_limit_bytes=vmem_limit,
        ),
    )(z_in, R)

    return out if Bp == B else out[:B]

    # TODO(synk): the backward-pass gradient hook (self.hook storing grads) is a
    # training-time side effect with no forward Pallas equivalent.


def _reference(z, R, latent_size):
    if latent_size == z.shape[-1]:
        return jnp.einsum("ij,bj->bi", R, z)
    d = R.shape[1]
    lo = jnp.einsum("ij,bj->bi", R, z[:, :d])
    return jnp.concatenate([lo, z[:, d:]], axis=-1)


if __name__ == "__main__":
    key = jax.random.PRNGKey(0)
    k_z, k_r = jax.random.split(key)

    B, D = 8, 256          # batch, total feature size of z
    latent = 128           # rotation dim d (partial rotation: d < D branch exercised)

    z = jax.random.normal(k_z, (B, D), dtype=jnp.float32)
    # Deterministic orthogonal rotation matrix (QR of a random normal matrix).
    a = jax.random.normal(k_r, (latent, latent), dtype=jnp.float32)
    R, _ = jnp.linalg.qr(a)

    # --- partial-rotation case (latent_size != z.size(-1)) ---
    out = rotate_forward(z, R, latent_size=latent)
    out = jax.block_until_ready(out)
    ref = _reference(z, R, latent)
    assert out.shape == (B, D) and out.dtype == z.dtype
    assert jnp.allclose(out, ref, atol=1e-4, rtol=1e-4)

    # --- full-rotation case (latent_size == z.size(-1)) ---
    z_full = z[:, :latent]
    out_full = rotate_forward(z_full, R, latent_size=latent)
    out_full = jax.block_until_ready(out_full)
    ref_full = _reference(z_full, R, latent)
    assert jnp.allclose(out_full, ref_full, atol=1e-4, rtol=1e-4)

    print("KERNEL_OK")
</pallas_src>

<mosaic_0001>
module attributes {stable_mosaic.version = 11 : i64} {
  func.func @_rotate_kernel(%arg0: i32, %arg1: memref<8x256xf32, #tpu.memory_space<vmem>>, %arg2: memref<128x128xf32, #tpu.memory_space<vmem>>, %arg3: memref<8x256xf32, #tpu.memory_space<vmem>>) attributes {dimension_semantics = [#tpu.dimension_semantics<parallel>], iteration_bounds = array<i64: 1>, scalar_prefetch = 0 : i64, scratch_operands = 0 : i64, tpu.core_type = #tpu.core_type<tc>, window_params = [{transform_indices = @transform_0, window_bounds = array<i64: 8, 256>}, {pipeline_mode = #tpu.pipeline_mode<synchronous>, transform_indices = @transform_1, window_bounds = array<i64: 128, 128>}, {transform_indices = @transform_2, window_bounds = array<i64: 8, 256>}]} {
    %c0 = arith.constant 0 : index
    %c0_0 = arith.constant 0 : index
    %0 = vector.load %arg1[%c0, %c0_0] : memref<8x256xf32, #tpu.memory_space<vmem>>, vector<8x128xf32>
    %c0_1 = arith.constant 0 : index
    %c0_2 = arith.constant 0 : index
    %1 = vector.load %arg2[%c0_1, %c0_2] : memref<128x128xf32, #tpu.memory_space<vmem>>, vector<128x128xf32>
    %cst = arith.constant dense<0.000000e+00> : vector<8x128xf32>
    %2 = tpu.matmul %0, %1, %cst {dimension_numbers = #tpu.dot_dimension_numbers<[1], [1], [0], [0], [0, 0, 1, 0], [], []>} : vector<8x128xf32>, vector<128x128xf32>, vector<8x128xf32> -> vector<8x128xf32>
    %c0_3 = arith.constant 0 : index
    %c0_4 = arith.constant 0 : index
    %3 = vector.load %arg3[%c0_3, %c0_4] : memref<8x256xf32, #tpu.memory_space<vmem>>, vector<8x128xf32>
    tpu.vector_store %arg3[%c0_3, %c0_4], %2 {strides = array<i32>} : memref<8x256xf32, #tpu.memory_space<vmem>>, vector<8x128xf32>,
    %c0_5 = arith.constant 0 : index
    %c128 = arith.constant 128 : index
    %4 = vector.load %arg1[%c0_5, %c128] : memref<8x256xf32, #tpu.memory_space<vmem>>, vector<8x128xf32>
    %c0_6 = arith.constant 0 : index
    %c128_7 = arith.constant 128 : index
    %5 = vector.load %arg3[%c0_6, %c128_7] : memref<8x256xf32, #tpu.memory_space<vmem>>, vector<8x128xf32>
    tpu.vector_store %arg3[%c0_6, %c128_7], %4 {strides = array<i32>} : memref<8x256xf32, #tpu.memory_space<vmem>>, vector<8x128xf32>,
    return
  }
  func.func @transform_0(%arg0: i32) -> (i32, i32) {
    %c0_i32 = arith.constant 0 : i32
    %c0_i32_0 = arith.constant 0 : i32
    return %arg0, %c0_i32 : i32, i32
  }
  func.func @transform_1(%arg0: i32) -> (i32, i32) {
    %c0_i32 = arith.constant 0 : i32
    %c0_i32_0 = arith.constant 0 : i32
    %c0_i32_1 = arith.constant 0 : i32
    return %c0_i32, %c0_i32_0 : i32, i32
  }
  func.func @transform_2(%arg0: i32) -> (i32, i32) {
    %c0_i32 = arith.constant 0 : i32
    %c0_i32_0 = arith.constant 0 : i32
    return %arg0, %c0_i32 : i32, i32
  }
}

</mosaic_0001>

<bundles_post_ra>
// kernel: tpu_custom_call.1
= control target key start
LH: loop header
LB: loop body
LE: loop exit
PB: predicated region body
PF: predicated region fallthrough
CT: control target
= control target key end

     0   :  { %7 = vsyncpa [#allocation3], 0  ;;  %s366_s0 = inlined_call_operand.hbm [shape: f32[8,256], index: 0, kind: input, shape index: {}]   ;;  %s367_s1 = inlined_call_operand.hbm [shape: f32[128,128], index: 1, kind: input, shape index: {}]   ;;  %s368_s2 = inlined_call_operand.hbm [shape: f32[8,256], index: 2, kind: output, shape index: {}]  }
   0x1   :  { %8 = vsyncpa [#allocation6], 0 }
   0x2   :  { %9 = vsyncpa [#allocation4], 0  ;;  %s300_s9 = smov [#allocation2]   ;;  %s301_s11 = smov [#allocation5]  }
   0x3   :  { %s16_s10 = sshll.u32 %s300_s9, 4  ;;  %s25_s12 = sshll.u32 %s301_s11, 4  ;;  %s17_s10 = int_to_ptr.vmem [resolvable:$true] %s16_s10  ;;  %s323_s12 = int_to_ptr.vmem [resolvable:$true] %s25_s12 }
   0x4   :  { %s228_s15 = scalar_lea.hbm %s366_s0, 256 }
   0x5   :  { %p229_p0 = scmp.ne.s32.totalorder %s366_s0, %s228_s15  ;;  %p232_p1 = scmp.lt.u32.totalorder %s228_s15, %s366_s0 }
   0x7   :  { %p234_p2 = pnand %p232_p1, %p229_p0 }
   0x9   :  { %237 = shalt.err (!%p234_p2)
}
   0xa   :  { %s238_s20 = scalar_lea.vmem %s17_s10, 256  ;;  %p243_p4 = scmp.lt.s32.totalorder %s17_s10, %s17_s10 }
   0xb   :  { %p239_p3 = scmp.ne.s32.totalorder %s17_s10, %s238_s20  ;;  %p244_p5 = scmp.lt.s32.totalorder %s238_s20, %s238_s20 }
   0xd   :  { %p245_p6 = por %p244_p5, %p243_p4 }
   0xf   :  { %p246_p7 = pnand %p245_p6, %p239_p3 }
  0x11   :  { %249 = shalt.err (!%p246_p7)
}
  0x12   :  { %19 = dma.hbm_to_vmem [thread:$0]  %s366_s0, 256, %s17_s10, [#allocation3]  }
  0x13   :  { %s250_s25 = scalar_lea.hbm %s367_s1, 2048 }
  0x14   :  { %p251_p8 = scmp.ne.s32.totalorder %s367_s1, %s250_s25  ;;  %p254_p9 = scmp.lt.u32.totalorder %s250_s25, %s367_s1 }
  0x16   :  { %p256_p10 = pnand %p254_p9, %p251_p8 }
  0x18   :  { %259 = shalt.err (!%p256_p10)
}
  0x19   :  { %s260_s30 = scalar_lea.vmem %s323_s12, 2048  ;;  %p265_p12 = scmp.lt.s32.totalorder %s323_s12, %s323_s12 }
  0x1a   :  { %p261_p11 = scmp.ne.s32.totalorder %s323_s12, %s260_s30  ;;  %p266_p13 = scmp.lt.s32.totalorder %s260_s30, %s260_s30 }
  0x1c   :  { %p267_p0 = por %p266_p13, %p265_p12 }
  0x1e   :  { %p268_p1 = pnand %p267_p0, %p261_p11 }
  0x20   :  { %271 = shalt.err (!%p268_p1)
}
  0x21   :  { %s302_s0 = smov 128   ;;  %s303_s3 = smov 8  }
  0x22   :  { %31 = dma.hbm_to_vmem [thread:$0]  %s367_s1, 2048, %s323_s12, [#allocation6], %s302_s0, %s302_s0, %s303_s3  }
  0x23   :  { %294 = dma.done.wait [#allocation3], 256  }
  0x24   :  { %295 = vsyncadd [#allocation3], 4294967040 }
  0x25   :  { %296 = dma.done.wait [#allocation6], 2048  }
  0x26   :  { %297 = vsyncadd [#allocation6], 4294965248  ;;  %v304_v0 = vmov 0.0|0.0   ;;  %vm305_vm0 = vmmov 0   ;;  %v306_v1 = vmov 0.0   ;;  %v39_v2 = vld [vmem:[#allocation5] sm:$0xff] }
  0x27   :  { %196 = vmatprep.subr.bf16.mxu0 %v304_v0  ;;  %193 = vmatprep.mubr.msk.f32.mxu0 %vm305_vm0, %v306_v1  ;;  %v40_v3 = vld [vmem:[#allocation5 + $0x8] sm:$0xff]  ;;  %v41_v5 = vld [vmem:[#allocation5 + $0x10] sm:$0xff]  ;;  %v42_v6 = vld [vmem:[#allocation5 + $0x18] sm:$0xff]  ;;  %s307_s1 = smov [#allocation7]  }
  0x28   :  { %v197_v4 = vpack.c.bf16 %v40_v3, %v39_v2  ;;  %v200_v7 = vpack.c.bf16 %v42_v6, %v41_v5  ;;  %v43_v8 = vld [vmem:[#allocation5 + $0x20] sm:$0xff]  ;;  %v44_v9 = vld [vmem:[#allocation5 + $0x28] sm:$0xff]  ;;  %v45_v11 = vld [vmem:[#allocation5 + $0x30] sm:$0xff]  ;;  %s134_s6 = sshll.u32 %s307_s1, 4  ;;  %s135_s6 = int_to_ptr.vmem [resolvable:$true] %s134_s6 }
  0x29   :  { %v203_v10 = vpack.c.bf16 %v44_v9, %v43_v8  ;;  %v46_v12 = vld [vmem:[#allocation5 + $0x38] sm:$0xff]  ;;  %v47_v14 = vld [vmem:[#allocation5 + $0x40] sm:$0xff]  ;;  %v48_v15 = vld [vmem:[#allocation5 + $0x48] sm:$0xff]  ;;  %s272_s7 = scalar_lea.vmem %s135_s6, 256  ;;  %p277_p3 = scmp.lt.s32.totalorder %s135_s6, %s135_s6 }
  0x2a   :  { %198 = vmatpush3.bf16.xpose.msra.mxu0 %v197_v4  ;;  %v206_v13 = vpack.c.bf16 %v46_v12, %v45_v11  ;;  %v209_v16 = vpack.c.bf16 %v48_v15, %v47_v14  ;;  %v49_v17 = vld [vmem:[#allocation5 + $0x50] sm:$0xff]  ;;  %v50_v18 = vld [vmem:[#allocation5 + $0x58] sm:$0xff]  ;;  %v51_v20 = vld [vmem:[#allocation5 + $0x60] sm:$0xff]  ;;  %p273_p2 = scmp.ne.s32.totalorder %s135_s6, %s272_s7  ;;  %p278_p4 = scmp.lt.s32.totalorder %s272_s7, %s272_s7 }
  0x2b   :  { %199 = vmatprep.subr.bf16.mxu0 %v304_v0  ;;  %v212_v19 = vpack.c.bf16 %v50_v18, %v49_v17  ;;  %v52_v21 = vld [vmem:[#allocation5 + $0x68] sm:$0xff]  ;;  %v53_v23 = vld [vmem:[#allocation5 + $0x70] sm:$0xff]  ;;  %v54_v24 = vld [vmem:[#allocation5 + $0x78] sm:$0xff] }
  0x2c   :  { %v215_v22 = vpack.c.bf16 %v52_v21, %v51_v20  ;;  %v218_v25 = vpack.c.bf16 %v54_v24, %v53_v23  ;;  %v38_v26 = vld [vmem:[#allocation2] sm:$0xff]  ;;  %v126_v27 = vld [vmem:[#allocation2 + $0x8] sm:$0xff]  ;;  %p279_p5 = por %p278_p4, %p277_p3 }
  0x2d   :  { %127 = vst [vmem:[#allocation7 + $0x8] sm:$0xff] %v126_v27 }
  0x2e   :  { %p280_p6 = pnand %p279_p5, %p273_p2 }
  0x32   :  { %201 = vmatpush3.bf16.xpose.msra.mxu0 %v200_v7 }
  0x33   :  { %202 = vmatprep.subr.bf16.mxu0 %v304_v0 }
  0x3a   :  { %204 = vmatpush3.bf16.xpose.msra.mxu0 %v203_v10 }
  0x3b   :  { %205 = vmatprep.subr.bf16.mxu0 %v304_v0 }
  0x42   :  { %207 = vmatpush3.bf16.xpose.msra.mxu0 %v206_v13 }
  0x43   :  { %208 = vmatprep.subr.bf16.mxu0 %v304_v0 }
  0x4a   :  { %210 = vmatpush3.bf16.xpose.msra.mxu0 %v209_v16 }
  0x4b   :  { %211 = vmatprep.subr.bf16.mxu0 %v304_v0 }
  0x52   :  { %213 = vmatpush3.bf16.xpose.msra.mxu0 %v212_v19 }
  0x53   :  { %214 = vmatprep.subr.bf16.mxu0 %v304_v0 }
  0x5a   :  { %216 = vmatpush3.bf16.xpose.msra.mxu0 %v215_v22 }
  0x5b   :  { %217 = vmatprep.subr.bf16.mxu0 %v304_v0 }
  0x62   :  { %219 = vmatpush3.bf16.xpose.msra.mxu0 %v218_v25 }
  0x69   :  { %194 = vmatmul.mubr.f32.vlgmr.msra.gmra.mrb[0].mxu0 %v38_v26 }
 0x13c   :  { %v121_v28 = vpop.f32.mrb[0].mxu0 }
 0x13d   :  { %125 = vst [vmem:[#allocation7] sm:$0xff] %v121_v28  ;;  %v195_v29 = vpop.f32.mrb[1].mxu0 }
 0x13e   :  { %283 = shalt.err (!%p280_p6)
}
 0x13f   :  { %s284_s10 = scalar_lea.hbm %s368_s2, 256 }
 0x140   :  { %p285_p7 = scmp.ne.s32.totalorder %s368_s2, %s284_s10  ;;  %p288_p8 = scmp.lt.u32.totalorder %s284_s10, %s368_s2 }
 0x142   :  { %p290_p9 = pnand %p288_p8, %p285_p7 }
 0x144   :  { %293 = shalt.err (!%p290_p9)
}
 0x145   :  { %137 = dma.vmem_to_hbm [thread:$0]  %s135_s6, 256, %s368_s2, [#allocation4]  }
 0x146   :  { %298 = dma.done.wait [#allocation4], 256  }
 0x147   :  { %299 = vsyncadd [#allocation4], 4294967040 }
 0x148   :  { %141 = vsyncpa [#allocation3], 1 }
 0x149   :  { %142 = vsyncpa [#allocation6], 1 }
 0x14a   :  { %143 = vsyncpa [#allocation4], 1 }

</bundles_post_ra>
